<compile_context>
chip_gen: v5e
topology: v5e:2x2
jax: 0.10.0
libtpu: 0.0.40
codegen_flags: <defaults>
</compile_context>

<pallas_src>
import jax
import jax.numpy as jnp
from jax.experimental import pallas as pl
from jax.experimental.pallas import tpu as pltpu

IN_DIM = 28 * 28   # 784
OUT_DIM = 10
TB_MAX = 1024      # batch-tile cap: ~1.6 MiB bf16 x-block, double-buffers
                   # comfortably inside v5e's 16 MiB default scoped VMEM.


def mnist_kernel(x_ref, w_ref, b_ref, o_ref):
    x = x_ref[...]                       # (TB, 784) bf16
    w = w_ref[...]                       # (784, 10) bf16
    b = b_ref[...]                       # (1, 10)   f32

    # Linear layer on the MXU: bf16 inputs, f32 accumulation.
    logits = jnp.dot(x, w, preferred_element_type=jnp.float32) + b  # (TB, 10) f32

    # Numerically-stable log_softmax over the class axis, all in f32.
    m = jnp.max(logits, axis=-1, keepdims=True)
    z = logits - m
    lse = jnp.log(jnp.sum(jnp.exp(z), axis=-1, keepdims=True))
    o_ref[...] = (z - lse).astype(o_ref.dtype)


def mnist_classifier(x, w, b, *, block_b=TB_MAX):
    """x: (B, 784); w: (784, 10); b: (10,)  ->  (B, 10) f32 log-probs."""
    B = x.shape[0]

    # bf16 inputs halve the dominant HBM traffic; params/bias math stays f32.
    x = x.astype(jnp.bfloat16)
    w = w.astype(jnp.bfloat16)
    b2d = b.astype(jnp.float32).reshape(1, OUT_DIM)

    # Batch tile: multiple of 8 (sublane granularity), capped at block_b.
    tb = min(block_b, ((B + 7) // 8) * 8)
    n_blocks = pl.cdiv(B, tb)
    pad_b = n_blocks * tb
    if pad_b != B:
        x = jnp.pad(x, ((0, pad_b - B), (0, 0)))

    out = pl.pallas_call(
        mnist_kernel,
        out_shape=jax.ShapeDtypeStruct((pad_b, OUT_DIM), jnp.float32),
        grid_spec=pltpu.PrefetchScalarGridSpec(
            num_scalar_prefetch=0,
            grid=(n_blocks,),
            in_specs=[
                # x: tiled along the batch axis -> pipelined DMA per step.
                pl.BlockSpec((tb, IN_DIM), lambda i: (i, 0)),
                # w, b: constant index_map -> stay VMEM-resident across steps.
                pl.BlockSpec((IN_DIM, OUT_DIM), lambda i: (0, 0)),
                pl.BlockSpec((1, OUT_DIM), lambda i: (0, 0)),
            ],
            out_specs=pl.BlockSpec((tb, OUT_DIM), lambda i: (i, 0)),
        ),
        compiler_params=pltpu.CompilerParams(
            dimension_semantics=("parallel",)),   # shard batch across TCs on v7x
    )(x, w, b2d)

    return out[:B] if pad_b != B else out


if __name__ == "__main__":
    key = jax.random.PRNGKey(0)
    kx, kw, kb = jax.random.split(key, 3)

    B = 8  # small demo batch (launch-overhead bound at this size)
    bound = 1.0 / (IN_DIM ** 0.5)  # PyTorch nn.Linear-style uniform init bound
    w = jax.random.uniform(kw, (IN_DIM, OUT_DIM), jnp.float32, -bound, bound)
    b = jax.random.uniform(kb, (OUT_DIM,), jnp.float32, -bound, bound)
    x = jax.random.normal(kx, (B, IN_DIM), jnp.float32)

    out = mnist_classifier(x, w, b)
    jax.block_until_ready(out)
    assert out.shape == (B, OUT_DIM)

    # Reference 1: same bf16 input quantization, f32 math -> tight tolerance.
    xb = x.astype(jnp.bfloat16).astype(jnp.float32)
    wb = w.astype(jnp.bfloat16).astype(jnp.float32)
    ref_bf16 = jax.nn.log_softmax(
        jnp.dot(xb, wb, preferred_element_type=jnp.float32) + b, axis=-1)
    assert jnp.allclose(out, ref_bf16, atol=1e-4, rtol=1e-4)

    # Reference 2: the original pure-f32 module semantics -> loose tolerance
    # (difference is only the bf16 input quantization).
    ref_f32 = jax.nn.log_softmax(x @ w + b, axis=-1)
    assert jnp.allclose(out, ref_f32, atol=5e-2, rtol=5e-2)

    print("KERNEL_OK")
</pallas_src>

<mosaic_0001>
module attributes {stable_mosaic.version = 11 : i64} {
  func.func @mnist_kernel(%arg0: i32, %arg1: memref<8x784xbf16, #tpu.memory_space<vmem>>, %arg2: memref<784x10xbf16, #tpu.memory_space<vmem>>, %arg3: memref<1x10xf32, #tpu.memory_space<vmem>>, %arg4: memref<8x10xf32, #tpu.memory_space<vmem>>) attributes {dimension_semantics = [#tpu.dimension_semantics<parallel>], iteration_bounds = array<i64: 1>, scalar_prefetch = 0 : i64, scratch_operands = 0 : i64, tpu.core_type = #tpu.core_type<tc>, window_params = [{transform_indices = @transform_0, window_bounds = array<i64: 8, 784>}, {pipeline_mode = #tpu.pipeline_mode<synchronous>, transform_indices = @transform_1, window_bounds = array<i64: 784, 10>}, {pipeline_mode = #tpu.pipeline_mode<synchronous>, transform_indices = @transform_2, window_bounds = array<i64: 1, 10>}, {transform_indices = @transform_3, window_bounds = array<i64: 8, 10>}]} {
    %c0 = arith.constant 0 : index
    %c0_0 = arith.constant 0 : index
    %0 = vector.load %arg1[%c0, %c0_0] : memref<8x784xbf16, #tpu.memory_space<vmem>>, vector<8x784xbf16>
    %c0_1 = arith.constant 0 : index
    %c0_2 = arith.constant 0 : index
    %1 = vector.load %arg2[%c0_1, %c0_2] : memref<784x10xbf16, #tpu.memory_space<vmem>>, vector<784x10xbf16>
    %c0_3 = arith.constant 0 : index
    %c0_4 = arith.constant 0 : index
    %2 = vector.load %arg3[%c0_3, %c0_4] : memref<1x10xf32, #tpu.memory_space<vmem>>, vector<1x10xf32>
    %cst = arith.constant dense<0.000000e+00> : vector<8x10xf32>
    %3 = tpu.matmul %0, %1, %cst {dimension_numbers = #tpu.dot_dimension_numbers<[1], [0], [0], [1], [0, 0, 1, 1], [], []>} : vector<8x784xbf16>, vector<784x10xbf16>, vector<8x10xf32> -> vector<8x10xf32>
    %4 = vector.broadcast %2 : vector<1x10xf32> to vector<8x10xf32>
    %5 = arith.addf %3, %4 : vector<8x10xf32>
    %cst_5 = arith.constant dense<0xFF800000> : vector<8xf32>
    %6 = vector.multi_reduction <maximumf>, %5, %cst_5 [1] : vector<8x10xf32> to vector<8xf32>
    %7 = vector.shape_cast %6 : vector<8xf32> to vector<8x1xf32>
    %8 = vector.broadcast %7 : vector<8x1xf32> to vector<8x10xf32>
    %9 = arith.subf %5, %8 : vector<8x10xf32>
    %10 = math.exp %9 : vector<8x10xf32>
    %cst_6 = arith.constant dense<0.000000e+00> : vector<8xf32>
    %11 = vector.multi_reduction <add>, %10, %cst_6 [1] : vector<8x10xf32> to vector<8xf32>
    %12 = vector.shape_cast %11 : vector<8xf32> to vector<8x1xf32>
    %13 = math.log %12 : vector<8x1xf32>
    %14 = vector.broadcast %13 : vector<8x1xf32> to vector<8x10xf32>
    %15 = arith.subf %9, %14 : vector<8x10xf32>
    %c0_7 = arith.constant 0 : index
    %c0_8 = arith.constant 0 : index
    %16 = vector.load %arg4[%c0_7, %c0_8] : memref<8x10xf32, #tpu.memory_space<vmem>>, vector<8x10xf32>
    tpu.vector_store %arg4[%c0_7, %c0_8], %15 {strides = array<i32>} : memref<8x10xf32, #tpu.memory_space<vmem>>, vector<8x10xf32>,
    return
  }
  func.func @transform_0(%arg0: i32) -> (i32, i32) {
    %c0_i32 = arith.constant 0 : i32
    %c0_i32_0 = arith.constant 0 : i32
    return %arg0, %c0_i32 : i32, i32
  }
  func.func @transform_1(%arg0: i32) -> (i32, i32) {
    %c0_i32 = arith.constant 0 : i32
    %c0_i32_0 = arith.constant 0 : i32
    %c0_i32_1 = arith.constant 0 : i32
    return %c0_i32, %c0_i32_0 : i32, i32
  }
  func.func @transform_2(%arg0: i32) -> (i32, i32) {
    %c0_i32 = arith.constant 0 : i32
    %c0_i32_0 = arith.constant 0 : i32
    %c0_i32_1 = arith.constant 0 : i32
    return %c0_i32, %c0_i32_0 : i32, i32
  }
  func.func @transform_3(%arg0: i32) -> (i32, i32) {
    %c0_i32 = arith.constant 0 : i32
    %c0_i32_0 = arith.constant 0 : i32
    return %arg0, %c0_i32 : i32, i32
  }
}

</mosaic_0001>

<bundles_post_ra>
// kernel: tpu_custom_call.1
= control target key start
LH: loop header
LB: loop body
LE: loop exit
PB: predicated region body
PF: predicated region fallthrough
CT: control target
= control target key end

     0   :  { %s1032_s0 = inlined_call_operand.vmem [shape: bf16[8,784], index: 0, kind: input, shape index: {}]   ;;  %s1033_s1 = inlined_call_operand.vmem [shape: bf16[784,10], index: 1, kind: input, shape index: {}]   ;;  %s1034_s2 = inlined_call_operand.vmem [shape: f32[1,10], index: 2, kind: input, shape index: {}]   ;;  %s1035_s3 = inlined_call_operand.hbm [shape: f32[8,10], index: 3, kind: output, shape index: {}]  }
   0x1   :  { %v769_v0 = vld [vmem:[%s1033_s1 + $0x38] sm:$0xff]  ;;  %v768_v3 = vld [vmem:[%s1033_s1 + $0x30] sm:$0xff]  ;;  %v767_v8 = vld [vmem:[%s1033_s1 + $0x28] sm:$0xff] }
   0x2   :  { %v777_v1 = vld [vmem:[%s1033_s1 + $0x78] sm:$0xff]  ;;  %444 = vmatpush.bf16.msra.mxu0 %v769_v0  ;;  %v776_v4 = vld [vmem:[%s1033_s1 + $0x70] sm:$0xff]  ;;  %v775_v9 = vld [vmem:[%s1033_s1 + $0x68] sm:$0xff] }
   0x3   :  { %v785_v2 = vld [vmem:[%s1033_s1 + $0xb8] sm:$0xff]  ;;  %457 = vmatpush.bf16.msra.mxu1 %v777_v1  ;;  %v784_v5 = vld [vmem:[%s1033_s1 + $0xb0] sm:$0xff]  ;;  %v783_v10 = vld [vmem:[%s1033_s1 + $0xa8] sm:$0xff] }
   0x4   :  { %470 = vmatpush.bf16.msra.mxu2 %v785_v2  ;;  %v793_v6 = vld [vmem:[%s1033_s1 + $0xf8] sm:$0xff]  ;;  %v792_v7 = vld [vmem:[%s1033_s1 + $0xf0] sm:$0xff]  ;;  %v791_v11 = vld [vmem:[%s1033_s1 + $0xe8] sm:$0xff] }
   0x5   :  { %483 = vmatpush.bf16.msra.mxu3 %v793_v6  ;;  %v766_v12 = vld [vmem:[%s1033_s1 + $0x20] sm:$0xff]  ;;  %v765_v16 = vld [vmem:[%s1033_s1 + $0x18] sm:$0xff] }
   0x6   :  { %445 = vmatpush.bf16.msra.mxu0 %v768_v3  ;;  %v774_v13 = vld [vmem:[%s1033_s1 + $0x60] sm:$0xff]  ;;  %v773_v17 = vld [vmem:[%s1033_s1 + $0x58] sm:$0xff] }
   0x7   :  { %458 = vmatpush.bf16.msra.mxu1 %v776_v4  ;;  %v782_v14 = vld [vmem:[%s1033_s1 + $0xa0] sm:$0xff]  ;;  %v781_v18 = vld [vmem:[%s1033_s1 + $0x98] sm:$0xff] }
   0x8   :  { %471 = vmatpush.bf16.msra.mxu2 %v784_v5  ;;  %v790_v15 = vld [vmem:[%s1033_s1 + $0xe0] sm:$0xff] }
   0x9   :  { %484 = vmatpush.bf16.msra.mxu3 %v792_v7 }
   0xa   :  { %446 = vmatpush.bf16.msra.mxu0 %v767_v8 }
   0xb   :  { %459 = vmatpush.bf16.msra.mxu1 %v775_v9 }
   0xc   :  { %472 = vmatpush.bf16.msra.mxu2 %v783_v10 }
   0xd   :  { %485 = vmatpush.bf16.msra.mxu3 %v791_v11 }
   0xe   :  { %447 = vmatpush.bf16.msra.mxu0 %v766_v12 }
   0xf   :  { %460 = vmatpush.bf16.msra.mxu1 %v774_v13 }
  0x10   :  { %473 = vmatpush.bf16.msra.mxu2 %v782_v14 }
  0x11   :  { %8 = vsyncpa [#allocation3], 0  ;;  %486 = vmatpush.bf16.msra.mxu3 %v790_v15  ;;  %v789_v19 = vld [vmem:[%s1033_s1 + $0xd8] sm:$0xff]  ;;  %v764_v20 = vld [vmem:[%s1033_s1 + $0x10] sm:$0xff]  ;;  %vm440_vm0 = vcmask 130048   ;;  %vm535_vm1 = vcmask 80896  }
  0x12   :  { %448 = vmatpush.bf16.msra.mxu0 %v765_v16  ;;  %v772_v21 = vld [vmem:[%s1033_s1 + $0x50] sm:$0xff]  ;;  %v763_v24 = vld [vmem:[%s1033_s1 + $0x8] sm:$0xff]  ;;  %v16_v26 = vld [vmem:[%s1032_s0] sm:$0xff]  ;;  %s556_s13 = sshll.u32 %s1035_s3, 4  ;;  %s557_s13 = int_to_ptr.hbm [resolvable:$true] %s556_s13 }
  0x13   :  { %461 = vmatpush.bf16.msra.mxu1 %v773_v17  ;;  %v780_v22 = vld [vmem:[%s1033_s1 + $0x90] sm:$0xff]  ;;  %v771_v25 = vld [vmem:[%s1033_s1 + $0x48] sm:$0xff]  ;;  %v126_v29 = vunpack.c.l.b16 %v16_v26  ;;  %v127_v31 = vunpack.c.h.b16 %v16_v26  ;;  %v762_v32 = vld [vmem:[%s1033_s1] sm:$0xff] }
  0x14   :  { %474 = vmatpush.bf16.msra.mxu2 %v781_v18  ;;  %v788_v23 = vld [vmem:[%s1033_s1 + $0xd0] sm:$0xff]  ;;  %v779_v27 = vld [vmem:[%s1033_s1 + $0x88] sm:$0xff]  ;;  %v770_v33 = vld [vmem:[%s1033_s1 + $0x40] sm:$0xff] }
  0x15   :  { %487 = vmatpush.bf16.msra.mxu3 %v789_v19  ;;  %v17_v28 = vld [vmem:[%s1032_s0 + $0x8] sm:$0xff]  ;;  %v801_v34 = vld [vmem:[%s1033_s1 + $0x138] sm:$0xff]  ;;  %v778_v36 = vld [vmem:[%s1033_s1 + $0x80] sm:$0xff]  ;;  %v133_v38 = vpack.c.b16 %v126_v29, %v126_v29  ;;  %v134_v39 = vpack.c.b16 %v127_v31, %v127_v31 }
  0x16   :  { %449 = vmatpush.bf16.msra.mxu0 %v764_v20  ;;  %v787_v30 = vld [vmem:[%s1033_s1 + $0xc8] sm:$0xff]  ;;  %v809_v35 = vld [vmem:[%s1033_s1 + $0x178] sm:$0xff]  ;;  %v128_v37 = vunpack.c.l.b16 %v17_v28  ;;  %v129_v40 = vunpack.c.h.b16 %v17_v28  ;;  %v786_v41 = vld [vmem:[%s1033_s1 + $0xc0] sm:$0xff] }
  0x17   :  { %462 = vmatpush.bf16.msra.mxu1 %v772_v21  ;;  %v810_v42 = vld [vmem:[%s1033_s1 + $0x180] sm:$0xff]  ;;  %v800_v43 = vld [vmem:[%s1033_s1 + $0x130] sm:$0xff]  ;;  %v799_v47 = vld [vmem:[%s1033_s1 + $0x128] sm:$0xff] }
  0x18   :  { %475 = vmatpush.bf16.msra.mxu2 %v780_v22  ;;  %v808_v44 = vld [vmem:[%s1033_s1 + $0x170] sm:$0xff]  ;;  %v135_v45 = vpack.c.b16 %v128_v37, %v128_v37  ;;  %v136_v46 = vpack.c.b16 %v129_v40, %v129_v40  ;;  %v807_v48 = vld [vmem:[%s1033_s1 + $0x168] sm:$0xff]  ;;  %v798_v49 = vld [vmem:[%s1033_s1 + $0x120] sm:$0xff] }
  0x19   :  { %488 = vmatpush.bf16.msra.mxu3 %v788_v23  ;;  %v806_v50 = vld [vmem:[%s1033_s1 + $0x160] sm:$0xff]  ;;  %v19_v51 = vld [vmem:[%s1032_s0 + $0x18] sm:$0xf]  ;;  %v796_v55 = vld [vmem:[%s1033_s1 + $0x110] sm:$0xff] }
  0x1a   :  { %450 = vmatpush.bf16.msra.mxu0 %v763_v24  ;;  %v797_v52 = vld [vmem:[%s1033_s1 + $0x118] sm:$0xff]  ;;  %v132_v54 = vunpack.c.l.b16 %v19_v51  ;;  %v804_v56 = vld [vmem:[%s1033_s1 + $0x150] sm:$0xff]  ;;  %v795_v58 = vld [vmem:[%s1033_s1 + $0x108] sm:$0xff] }
  0x1b   :  { %463 = vmatpush.bf16.msra.mxu1 %v771_v25  ;;  %v805_v53 = vld [vmem:[%s1033_s1 + $0x158] sm:$0xff]  ;;  %v803_v59 = vld [vmem:[%s1033_s1 + $0x148] sm:$0xff]  ;;  %v18_v60 = vld [vmem:[%s1032_s0 + $0x10] sm:$0xff] }
  0x1c   :  { %476 = vmatpush.bf16.msra.mxu2 %v779_v27  ;;  %v139_v57 = vpack.c.b16 %v132_v54, %v132_v54  ;;  %v130_v61 = vunpack.c.l.b16 %v18_v60  ;;  %v131_v62 = vunpack.c.h.b16 %v18_v60  ;;  %v794_v63 = vld [vmem:[%s1033_s1 + $0x100] sm:$0xff] }
  0x1d   :  { %489 = vmatpush.bf16.msra.mxu3 %v787_v30  ;;  %v802_v0 = vld [vmem:[%s1033_s1 + $0x140] sm:$0xff]  ;;  %s843_s1 = smov [#allocation2]  }
  0x1e   :  { %451 = vmatpush.bf16.msra.mxu0 %v762_v32  ;;  %v137_v1 = vpack.c.b16 %v130_v61, %v130_v61  ;;  %v138_v2 = vpack.c.b16 %v131_v62, %v131_v62  ;;  %v812_v9 = vld [vmem:[%s1034_s2] ss:$0 sm:$0xff]  ;;  %s554_s2 = sshll.u32 %s843_s1, 4  ;;  %s555_s2 = int_to_ptr.vmem [resolvable:$true] %s554_s2 }
  0x1f   :  { %464 = vmatpush.bf16.msra.mxu1 %v770_v33 }
  0x20   :  { %477 = vmatpush.bf16.msra.mxu2 %v778_v36 }
  0x21   :  { %452 = vmatmul.bf16.vlgmr.msra.gmra.mxu0 %v133_v38  ;;  %490 = vmatpush.bf16.msra.mxu3 %v786_v41 }
  0x22   :  { %496 = vmatpush.bf16.msrb.mxu0 %v801_v34  ;;  %465 = vmatmul.bf16.vlgmr.msra.gmra.mxu1 %v134_v39 }
  0x23   :  { %509 = vmatpush.bf16.msrb.mxu1 %v809_v35  ;;  %478 = vmatmul.bf16.vlgmr.msra.gmra.mxu2 %v135_v45 }
  0x24   :  { %529 = vmatpush.bf16.msrb.mxu2 %v810_v42  ;;  %491 = vmatmul.bf16.vlgmr.msra.gmra.mxu3 %v136_v46 }
  0x26   :  { %497 = vmatpush.bf16.msrb.mxu0 %v800_v43 }
  0x27   :  { %510 = vmatpush.bf16.msrb.mxu1 %v808_v44 }
  0x2a   :  { %498 = vmatpush.bf16.msrb.mxu0 %v799_v47 }
  0x2b   :  { %511 = vmatpush.bf16.msrb.mxu1 %v807_v48 }
  0x2e   :  { %499 = vmatpush.bf16.msrb.mxu0 %v798_v49 }
  0x2f   :  { %512 = vmatpush.bf16.msrb.mxu1 %v806_v50 }
  0x32   :  { %500 = vmatpush.bf16.msrb.mxu0 %v797_v52 }
  0x33   :  { %513 = vmatpush.bf16.msrb.mxu1 %v805_v53  ;;  %761 = vmatmul.msk.bf16.vlgmr.msrb.gmra.mxu2 %vm440_vm0, %v139_v57 }
  0x36   :  { %501 = vmatpush.bf16.msrb.mxu0 %v796_v55 }
  0x37   :  { %514 = vmatpush.bf16.msrb.mxu1 %v804_v56 }
  0x3a   :  { %502 = vmatpush.bf16.msrb.mxu0 %v795_v58 }
  0x3b   :  { %515 = vmatpush.bf16.msrb.mxu1 %v803_v59 }
  0x3e   :  { %503 = vmatpush.bf16.msrb.mxu0 %v794_v63 }
  0x3f   :  { %516 = vmatpush.bf16.msrb.mxu1 %v802_v0 }
  0x41   :  { %504 = vmatmul.bf16.vlgmr.msrb.gmra.mxu0 %v137_v1 }
  0x42   :  { %517 = vmatmul.bf16.vlgmr.msrb.gmra.mxu1 %v138_v2 }
  0x9e   :  { %v453_v3 = vpop.f32.mrf.mxu0 }
  0x9f   :  { %v466_v4 = vpop.f32.mrf.mxu1  ;;  %v454_v10 = vadd.f32 %v812_v9, %v453_v3 }
  0xa1   :  { %v467_v13 = vadd.f32 %v466_v4, %v454_v10 }
  0xa6   :  { %v455_v5 = vpop.f32.mrf.mxu0  ;;  %v479_v7 = vpop.f32.mrf.mxu2 }
  0xa7   :  { %v468_v6 = vpop.f32.mrf.mxu1  ;;  %v492_v8 = vpop.f32.mrf.mxu3  ;;  %v480_v14 = vadd.f32 %v479_v7, %v467_v13 }
  0xa9   :  { %v493_v16 = vadd.f32 %v492_v8, %v480_v14 }
  0xae   :  { %v481_v11 = vpop.f32.mrf.mxu2 }
  0xaf   :  { %v494_v12 = vpop.f32.mrf.mxu3 }
  0xb6   :  { %v531_v15 = vpop.f32.mrf.mxu2 }
  0xbe   :  { %v505_v17 = vpop.f32.mrf.mxu0  ;;  %v533_v21 = vpop.f32.mrf.mxu2 }
  0xbf   :  { %v518_v18 = vpop.f32.mrf.mxu1  ;;  %v506_v19 = vadd.f32 %v505_v17, %v493_v16 }
  0xc1   :  { %v519_v20 = vadd.f32 %v518_v18, %v506_v19 }
  0xc3   :  { %v532_v22 = vadd.f32 %v531_v15, %v519_v20 }
  0xc5   :  { %v536_v23 = vsel %vm535_vm1, %v532_v22, -inf }
  0xc6   :  { %v507_v24 = vpop.f32.mrf.mxu0  ;;  %537 = vmax.xlane.f32.xlu0 %v536_v23 }
  0xc7   :  { %v520_v25 = vpop.f32.mrf.mxu1 }
 0x139   :  { %v538_v26 = vpop.xlane.xlu0 %537 }
 0x13a   :  { %v539_v27 = vsub.f32 %v532_v22, %v538_v26 }
 0x13c   :  { %v540_v28 = vmul.f32 1.442695, %v539_v27 }
 0x13e   :  { %813 = vpow2.f32 %v540_v28 }
 0x144   :  { %v814_v29 = vpop.eup %813 }
 0x145   :  { %v542_v30 = vsel %vm535_vm1, %v814_v29, 0.0 }
 0x146   :  { %543 = vadd.xlane.f32.xlu0 %v542_v30 }
 0x1b9   :  { %v544_v31 = vpop.xlane.xlu0 %543 }
 0x1ba   :  { %815 = vlog2.f32 %v544_v31 }
 0x1c0   :  { %v816_v32 = vpop.eup %815 }
 0x1c1   :  { %v546_v33 = vmul.f32 0.6931472, %v816_v32 }
 0x1c3   :  { %v547_v34 = vsub.f32 %v539_v27, %v546_v33 }
 0x1c5   :  { %548 = vst.msk [vmem:[#allocation2] sm:$0xff] %vm535_vm1, %v547_v34 }
 0x1c6   :  { %559 = dma.vmem_to_hbm [thread:$0]  %s555_s2, 128, %s557_s13, [#allocation3]  }
 0x1c7   :  { %841 = dma.done.wait [#allocation3], 128  }
 0x1c8   :  { %842 = vsyncadd [#allocation3], 4294967168 }
 0x1c9   :  { %564 = vsyncpa [#allocation3], 1 }

</bundles_post_ra>
